<compile_context>
chip_gen: v5e
topology: v5e:2x2
jax: 0.10.0
libtpu: 0.0.40
codegen_flags: <defaults>
</compile_context>

<pallas_src>
import jax
import jax.numpy as jnp
from jax.experimental import pallas as pl
from jax.experimental.pallas import tpu as pltpu


def _drloss_dot_kernel(feat_ref, target_ref, out_ref):
    """One grid step: (tile_n, D) row tile -> lane-major (1, tile_n) row dots."""
    f = feat_ref[...].astype(jnp.float32)
    t = target_ref[...].astype(jnp.float32)
    # Lane-reduce over D; store lane-dense into the (1, tile_n) output block.
    out_ref[0, :] = jnp.sum(f * t, axis=1)


def _vmem_capacity_bytes():
    try:
        return int(pltpu.get_tpu_info().vmem_capacity_bytes)
    except Exception:
        return 64 * 1024 * 1024  # conservative (v7x-sized) fallback


def _pick_tile_n(n_rows, d, itemsize, budget_bytes, tile_n):
    if tile_n is None:
        lanes = ((d + 127) // 128) * 128                # VMEM lane padding of D
        # Per-row VMEM footprint: 2 streamed operands x 2 pipeline buffers,
        # ~3 f32 temporaries (upcasts + product), plus the lane-dense output.
        per_row = 4 * lanes * itemsize + 3 * lanes * 4 + 16
        tile_n = int(budget_bytes // per_row)
    tile_n = min(max(int(tile_n), 1), n_rows)
    if (tile_n == n_rows and n_rows >= 256
            and (n_rows // 2) * d * itemsize >= (2 << 20)):
        # Single-tile problem that is big enough to split: give v7x megacore's
        # second TensorCore work (grid axis is "parallel"); near-free on 1-TC chips.
        tile_n = ((-(-n_rows // 2) + 127) // 128) * 128
    if tile_n != n_rows:
        # Multiple tiles: a multiple of 128 satisfies both the lane rule of the
        # (1, tile_n) output block and the sublane rule of (tile_n, D) inputs.
        tile_n = min(max(128, (tile_n // 128) * 128), n_rows)
    return tile_n
    # TODO(synk): for extremely large D (one 128-row block no longer fits VMEM)
    # add a second "arbitrary" grid axis over D with a per-row dot accumulator.


def dr_loss(feat, target, h_norm2=None, m_norm2=None, avg_factor=None, *,
            reduction='mean', loss_weight=1.0, reg_lambda=0.0, tile_n=None):
    # The reference forward ignores `reduction` (always mean) and `reg_lambda`.
    assert avg_factor is None
    del reduction, reg_lambda

    n, d = feat.shape
    itemsize = jnp.dtype(feat.dtype).itemsize

    vmem_cap = _vmem_capacity_bytes()
    # ~48 MiB pipelined footprint on 128-MiB chips (v5e/v6e), ~24 MiB on v7x.
    budget = min(max(vmem_cap * 3 // 8, 16 << 20), 48 << 20)
    vmem_limit = max(min(2 * budget, vmem_cap - (4 << 20)), budget)

    tn = _pick_tile_n(n, d, itemsize, budget, tile_n)
    num_tiles = -(-n // tn)

    dots = pl.pallas_call(
        _drloss_dot_kernel,
        out_shape=jax.ShapeDtypeStruct((1, n), jnp.float32),
        grid_spec=pltpu.PrefetchScalarGridSpec(
            num_scalar_prefetch=0,
            grid=(num_tiles,),
            in_specs=[
                pl.BlockSpec((tn, d), lambda i: (i, 0)),   # feat   (orig dtype)
                pl.BlockSpec((tn, d), lambda i: (i, 0)),   # target (orig dtype)
            ],
            out_specs=pl.BlockSpec((1, tn), lambda i: (0, i)),
        ),
        compiler_params=pltpu.CompilerParams(
            # Independent row tiles -> "parallel": v7x megacore splits the row
            # range across both TensorCores; no-op on single-TC v5e/v6e.
            dimension_semantics=("parallel",),
            vmem_limit_bytes=int(vmem_limit),
        ),
    )(feat, target)

    # Tiny (N,)-sized epilogue in plain XLA (negligible vs. the streamed input).
    dot = dots[0]
    f32 = jnp.float32
    h = jnp.ones((n,), f32) if h_norm2 is None else jnp.asarray(h_norm2, f32).reshape(n)
    m = jnp.ones((n,), f32) if m_norm2 is None else jnp.asarray(m_norm2, f32).reshape(n)
    loss = 0.5 * jnp.mean((dot - m * h) ** 2 / h)
    return loss * loss_weight


def dr_loss_ref(feat, target, h_norm2=None, m_norm2=None, loss_weight=1.0):
    feat = feat.astype(jnp.float32)
    target = target.astype(jnp.float32)
    dot = jnp.sum(feat * target, axis=1)
    if h_norm2 is None:
        h_norm2 = jnp.ones_like(dot)
    if m_norm2 is None:
        m_norm2 = jnp.ones_like(dot)
    loss = 0.5 * jnp.mean((dot - m_norm2 * h_norm2) ** 2 / h_norm2)
    return loss * loss_weight


if __name__ == "__main__":
    key = jax.random.PRNGKey(0)
    k1, k2, k3, k4, k5, k6 = jax.random.split(key, 6)

    # --- Small f32 case (matches DRLoss()(feat, target)) ---
    N, D = 8, 32
    feat = jax.random.normal(k1, (N, D), jnp.float32)
    target = jax.random.normal(k2, (N, D), jnp.float32)
    h_norm2 = jax.random.uniform(k3, (N,), jnp.float32, minval=0.5, maxval=1.5)
    m_norm2 = jax.random.uniform(k4, (N,), jnp.float32, minval=0.5, maxval=1.5)

    out_default = dr_loss(feat, target)
    jax.block_until_ready(out_default)
    assert jnp.allclose(out_default, dr_loss_ref(feat, target), rtol=1e-5, atol=1e-5)

    out_hm = dr_loss(feat, target, h_norm2, m_norm2)
    jax.block_until_ready(out_hm)
    assert jnp.allclose(out_hm, dr_loss_ref(feat, target, h_norm2, m_norm2),
                        rtol=1e-5, atol=1e-5)

    # --- Ragged row count, single full-array tile ---
    N2 = 50
    feat2 = jax.random.normal(k5, (N2, D), jnp.float32)
    target2 = jax.random.normal(k6, (N2, D), jnp.float32)
    out_ragged = dr_loss(feat2, target2)
    jax.block_until_ready(out_ragged)
    assert jnp.allclose(out_ragged, dr_loss_ref(feat2, target2), rtol=1e-5, atol=1e-5)

    # --- bf16 streaming path (no wrapper upcast; kernel casts in VMEM) ---
    N3 = 16
    feat3 = jax.random.normal(k5, (N3, D), jnp.float32).astype(jnp.bfloat16)
    target3 = jax.random.normal(k6, (N3, D), jnp.float32).astype(jnp.bfloat16)
    out_bf16 = dr_loss(feat3, target3)
    jax.block_until_ready(out_bf16)
    assert jnp.allclose(out_bf16, dr_loss_ref(feat3, target3), rtol=1e-4, atol=1e-4)

    # --- Multi-tile grid with ragged last tile (forced small tile_n) ---
    N4, D4 = 600, 128
    feat4 = jax.random.normal(k1, (N4, D4), jnp.float32)
    target4 = jax.random.normal(k2, (N4, D4), jnp.float32)
    h4 = jax.random.uniform(k3, (N4,), jnp.float32, minval=0.5, maxval=1.5)
    m4 = jax.random.uniform(k4, (N4,), jnp.float32, minval=0.5, maxval=1.5)
    out_multi = dr_loss(feat4, target4, h4, m4, tile_n=256)
    jax.block_until_ready(out_multi)
    assert jnp.allclose(out_multi, dr_loss_ref(feat4, target4, h4, m4),
                        rtol=1e-4, atol=1e-4)

    print("KERNEL_OK")
</pallas_src>

<mosaic_0001>
module attributes {stable_mosaic.version = 11 : i64} {
  func.func @_drloss_dot_kernel(%arg0: i32, %arg1: memref<8x32xf32, #tpu.memory_space<vmem>>, %arg2: memref<8x32xf32, #tpu.memory_space<vmem>>, %arg3: memref<1x8xf32, #tpu.memory_space<vmem>>) attributes {dimension_semantics = [#tpu.dimension_semantics<parallel>], iteration_bounds = array<i64: 1>, scalar_prefetch = 0 : i64, scratch_operands = 0 : i64, tpu.core_type = #tpu.core_type<tc>, window_params = [{transform_indices = @transform_0, window_bounds = array<i64: 8, 32>}, {transform_indices = @transform_1, window_bounds = array<i64: 8, 32>}, {transform_indices = @transform_2, window_bounds = array<i64: 1, 8>}]} {
    %c0 = arith.constant 0 : index
    %c0_0 = arith.constant 0 : index
    %0 = vector.load %arg1[%c0, %c0_0] : memref<8x32xf32, #tpu.memory_space<vmem>>, vector<8x32xf32>
    %c0_1 = arith.constant 0 : index
    %c0_2 = arith.constant 0 : index
    %1 = vector.load %arg2[%c0_1, %c0_2] : memref<8x32xf32, #tpu.memory_space<vmem>>, vector<8x32xf32>
    %2 = arith.mulf %0, %1 : vector<8x32xf32>
    %cst = arith.constant dense<0.000000e+00> : vector<8xf32>
    %3 = vector.multi_reduction <add>, %2, %cst [1] : vector<8x32xf32> to vector<8xf32>
    %c0_3 = arith.constant 0 : index
    %c0_4 = arith.constant 0 : index
    %4 = vector.load %arg3[%c0_3, %c0_4] : memref<1x8xf32, #tpu.memory_space<vmem>>, vector<1x8xf32>
    %5 = vector.shape_cast %4 : vector<1x8xf32> to vector<8xf32>
    %6 = vector.shape_cast %3 : vector<8xf32> to vector<1x8xf32>
    tpu.vector_store %arg3[%c0_3, %c0_4], %6 {strides = array<i32>} : memref<1x8xf32, #tpu.memory_space<vmem>>, vector<1x8xf32>,
    return
  }
  func.func @transform_0(%arg0: i32) -> (i32, i32) {
    %c0_i32 = arith.constant 0 : i32
    %c0_i32_0 = arith.constant 0 : i32
    return %arg0, %c0_i32 : i32, i32
  }
  func.func @transform_1(%arg0: i32) -> (i32, i32) {
    %c0_i32 = arith.constant 0 : i32
    %c0_i32_0 = arith.constant 0 : i32
    return %arg0, %c0_i32 : i32, i32
  }
  func.func @transform_2(%arg0: i32) -> (i32, i32) {
    %c0_i32 = arith.constant 0 : i32
    %c0_i32_0 = arith.constant 0 : i32
    return %c0_i32, %arg0 : i32, i32
  }
}

</mosaic_0001>

<bundles_post_ra>
// kernel: tpu_custom_call.1
= control target key start
LH: loop header
LB: loop body
LE: loop exit
PB: predicated region body
PF: predicated region fallthrough
CT: control target
= control target key end

     0   :  { %7 = vsyncpa [#allocation3], 0  ;;  %s180_s0 = inlined_call_operand.hbm [shape: f32[8,32], index: 0, kind: input, shape index: {}]   ;;  %s181_s1 = inlined_call_operand.hbm [shape: f32[8,32], index: 1, kind: input, shape index: {}]   ;;  %s182_s2 = inlined_call_operand.hbm [shape: f32[1,8], index: 2, kind: output, shape index: {}]  }
   0x1   :  { %8 = vsyncpa [#allocation6], 0 }
   0x2   :  { %9 = vsyncpa [#allocation4], 0  ;;  %s15_s11 = sshll.u32 %s180_s0, 4  ;;  %s153_s12 = smov [#allocation2]   ;;  %s16_s11 = int_to_ptr.hbm [resolvable:$true] %s15_s11 }
   0x3   :  { %s17_s13 = sshll.u32 %s153_s12, 4  ;;  %s26_s16 = sshll.u32 %s181_s1, 4  ;;  %s18_s13 = int_to_ptr.vmem [resolvable:$true] %s17_s13  ;;  %s27_s16 = int_to_ptr.hbm [resolvable:$true] %s26_s16 }
   0x4   :  { %20 = dma.hbm_to_vmem [thread:$0]  %s16_s11, 128, %s18_s13, [#allocation3]  }
   0x5   :  { %s154_s17 = smov [#allocation5]  }
   0x6   :  { %s28_s18 = sshll.u32 %s154_s17, 4  ;;  %s29_s18 = int_to_ptr.vmem [resolvable:$true] %s28_s18 }
   0x7   :  { %31 = dma.hbm_to_vmem [thread:$0]  %s27_s16, 128, %s29_s18, [#allocation6]  }
   0x8   :  { %147 = dma.done.wait [#allocation3], 128  }
   0x9   :  { %148 = vsyncadd [#allocation3], 4294967168 }
   0xa   :  { %149 = dma.done.wait [#allocation6], 128  }
   0xb   :  { %150 = vsyncadd [#allocation6], 4294967168  ;;  %v40_v0 = vld [vmem:[#allocation2] sm:$0xff]  ;;  %v41_v1 = vld [vmem:[#allocation5] sm:$0xff]  ;;  %vm43_vm0 = vcmask 261120   ;;  %v48_v4 = vlaneseq  ;;  %s155_s0 = smov [#allocation7]  }
   0xc   :  { %v42_v2 = vmul.f32 %v41_v1, %v40_v0  ;;  %s59_s1 = sshll.u32 %s155_s0, 4  ;;  %s61_s21 = sshll.u32 %s182_s2, 4  ;;  %vm52_vm1 = vcmask 57344   ;;  %s60_s1 = int_to_ptr.vmem [resolvable:$true] %s59_s1  ;;  %s62_s21 = int_to_ptr.hbm [resolvable:$true] %s61_s21 }
   0xd   :  { %v49_v5 = vand.u32 127, %v48_v4 }
   0xe   :  { %v44_v3 = vsel %vm43_vm0, %v42_v2, 0.0 }
   0xf   :  { %45 = vadd.xlane.f32.xlu0 %v44_v3 }
  0x82   :  { %v46_v6 = vpop.xlane.xlu0 %45 }
  0x83   :  { %v50_v7 = vperm.slane %v46_v6, %v49_v5 }
  0x85   :  { %53 = vst.msk [vmem:[#allocation7] sm:$0x1] %vm52_vm1, %v50_v7 }
  0x86   :  { %64 = dma.vmem_to_hbm [thread:$0]  %s60_s1, 16, %s62_s21, [#allocation4]  }
  0x87   :  { %151 = dma.done.wait [#allocation4], 16  }
  0x88   :  { %152 = vsyncadd [#allocation4], 4294967280 }
  0x89   :  { %69 = vsyncpa [#allocation3], 1 }
  0x8a   :  { %70 = vsyncpa [#allocation6], 1 }
  0x8b   :  { %71 = vsyncpa [#allocation4], 1 }

</bundles_post_ra>
